<compile_context>
chip_gen: v6e
topology: v6e:2x2x1
jax: 0.10.0
libtpu: 0.0.40
codegen_flags: <defaults>
</compile_context>

<pallas_src>
import numpy as np
import jax
import jax.numpy as jnp
from jax.experimental import pallas as pl
from jax.experimental.pallas import tpu as pltpu


# --------------------------------------------------------------------------
# Icosahedron topology + mat_neighbors construction (numpy port of __init__)
# (Pure host-side, run once at module-construction time — not a kernel.)
# --------------------------------------------------------------------------
def make_icosahedron():
    phi = (1.0 + 5.0 ** 0.5) / 2.0
    verts = np.array(
        [
            [-1.0, phi, 0.0], [1.0, phi, 0.0], [-1.0, -phi, 0.0], [1.0, -phi, 0.0],
            [0.0, -1.0, phi], [0.0, 1.0, phi], [0.0, -1.0, -phi], [0.0, 1.0, -phi],
            [phi, 0.0, -1.0], [phi, 0.0, 1.0], [-phi, 0.0, -1.0], [-phi, 0.0, 1.0],
        ],
        dtype=np.float64,
    )
    d = np.linalg.norm(verts[:, None, :] - verts[None, :, :], axis=-1)
    edge_len = np.min(d[d > 1e-9])
    edges = []
    for i in range(len(verts)):
        for j in range(i + 1, len(verts)):
            if abs(d[i, j] - edge_len) < 1e-6:
                edges.append([i, j])
    return verts, edges


def get_neighbors(list_edges, nbr_vert):
    neighbors = [[] for _ in range(nbr_vert)]
    for edge in list_edges:
        v1, v2 = edge[0], edge[1]
        neighbors[v1].append(v2)
        neighbors[v2].append(v1)
    return neighbors


def sort_neighbors(list_neighbors, nbr_vert):
    new_neighbors = [[] for _ in range(nbr_vert)]
    for i in range(nbr_vert):
        neighbors = list_neighbors[i].copy()
        vert = neighbors[0]
        new_neighbors[i].append(vert)
        neighbors.remove(vert)
        while len(neighbors) != 0:
            common = list(set(neighbors).intersection(list_neighbors[vert]))
            vert = common[0]
            new_neighbors[i].append(vert)
            neighbors.remove(vert)
    return new_neighbors


def sort_rotation(verts, list_neighbors, nbr_vert):
    new_neighbors = [[] for _ in range(nbr_vert)]
    for i in range(nbr_vert):
        p0 = verts[i]
        p1 = verts[list_neighbors[i][0]]
        p2 = verts[list_neighbors[i][1]]
        v1 = p1 - p0
        v2 = p2 - p1
        vn = np.cross(v1, v2)
        n = vn / np.linalg.norm(vn)
        milieu = p1 + v2 / 2.0
        v3 = milieu - p0
        cg = p0 + 2.0 * v3 / 3.0
        if np.dot(n, cg) > 1.0:
            new_neighbors[i] = list_neighbors[i]
        else:
            list_neighbors[i].reverse()
            new_neighbors[i] = list_neighbors[i]
    return new_neighbors


def get_mat_neighbors(list_neighbors, nbr_vert):
    mat = np.zeros((nbr_vert, nbr_vert * 7), dtype=np.float32)
    for index_cam in range(nbr_vert):
        mat[index_cam][index_cam * 7] = 1.0
        for index_neighbor in range(len(list_neighbors[index_cam])):
            mat[list_neighbors[index_cam][index_neighbor]][
                index_cam * 7 + index_neighbor + 1
            ] = 1.0
    return mat


def build_mat_neighbors():
    verts, list_edges = make_icosahedron()
    nbr_vert = int(np.max(list_edges) + 1)
    neigh = get_neighbors(list_edges, nbr_vert)
    neigh = sort_neighbors(neigh, nbr_vert)
    neigh = sort_rotation(verts, neigh, nbr_vert)
    return get_mat_neighbors(neigh, nbr_vert), nbr_vert


# --------------------------------------------------------------------------
# Init-time parameter fusion (done ONCE, outside the per-call hot path).
# No column padding: kernel output width is exactly C*O (lane-dense enough;
# the last block dim equals the full array dim so it is legal).
# --------------------------------------------------------------------------
def prepare_fused_params(mat_neighbors, weight, bias, nbr_cam, nbr_features, out_channels):
    C, F, O = nbr_cam, nbr_features, out_channels
    m3 = mat_neighbors.reshape(C, C, 7)          # [src_cam, dst_cam, n]
    w3 = weight.reshape(O, F, 7)                 # [o, f, n]
    # -> [src_cam, f, dst_cam, o] -> (C*F, C*O); already in "x @ W" orientation.
    w_fused = jnp.einsum("acn,ofn->afco", m3, w3).reshape(C * F, C * O)
    b_fused = jnp.tile(bias, C)                  # index (c'*O + o) -> bias[o]
    # bf16 weights for the MXU (entries are exact copies of nn.Linear weights);
    # bias stays f32 and is added after the f32 accumulation.
    return (
        w_fused.astype(jnp.bfloat16),
        b_fused.reshape(1, C * O).astype(jnp.float32),
    )


# --------------------------------------------------------------------------
# Pallas kernel: one (tm, K)bf16 @ (K, N)bf16 MXU pass with f32 accumulation,
# bias add, f32 store.
# --------------------------------------------------------------------------
def _fused_linear_kernel(x_ref, w_ref, b_ref, o_ref):
    o_ref[...] = (
        jnp.dot(x_ref[...], w_ref[...], preferred_element_type=jnp.float32)
        + b_ref[...]
    )


_SMALL_M_FAST_PATH = 256  # below this row count, plain XLA beats a 1-step grid


def _pick_tile_m(M):
    # Fixed-size cdiv tiling (review item): multiple of 8 (sublane), capped at
    # 512 rows (tiny VMEM footprint: ~0.1 MiB x-in + ~0.4 MiB f32-out per
    # buffer, safe on v5e's 16 MiB scoped and v7x's 64 MiB physical VMEM), and
    # chosen so the grid has >= 2 steps whenever possible so the "parallel"
    # axis can shard across both TensorCores on v7x.
    if M <= 1024:
        return max(8, ((pl.cdiv(M, 2) + 7) // 8) * 8)
    return 512


def fused_icosa_linear(x_bf16, w_fused_bf16, bias_row):
    M, K = x_bf16.shape
    Kw, N = w_fused_bf16.shape
    assert K == Kw
    tm = _pick_tile_m(M)
    grid = (pl.cdiv(M, tm),)   # ragged last block handled by Pallas masking
    cost = pl.CostEstimate(
        flops=2 * M * K * N,
        transcendentals=0,
        bytes_accessed=M * K * 2 + K * N * 2 + N * 4 + M * N * 4,
    )
    return pl.pallas_call(
        _fused_linear_kernel,
        out_shape=jax.ShapeDtypeStruct((M, N), jnp.float32),
        grid_spec=pltpu.PrefetchScalarGridSpec(
            num_scalar_prefetch=0,
            grid=grid,
            in_specs=[
                pl.BlockSpec((tm, K), lambda i: (i, 0)),   # streamed x rows (bf16)
                pl.BlockSpec((K, N), lambda i: (0, 0)),    # resident fused weight (~36 KiB bf16)
                pl.BlockSpec((1, N), lambda i: (0, 0)),    # resident bias row (f32)
            ],
            out_specs=pl.BlockSpec((tm, N), lambda i: (i, 0)),
        ),
        compiler_params=pltpu.CompilerParams(
            dimension_semantics=("parallel",),
        ),
        cost_estimate=cost,
    )(x_bf16, w_fused_bf16, bias_row)


# --------------------------------------------------------------------------
# Forward pass (mirrors IcosahedronLinear.forward with module == nn.Linear):
# a single matmul + free reshapes.  No padding, no post-kernel slice.
# --------------------------------------------------------------------------
def icosahedron_linear_forward(x, w_fused_bf16, bias_row, out_channels):
    batch_size, nbr_cam, nbr_features = x.shape
    x_flat = x.reshape(batch_size, nbr_cam * nbr_features).astype(jnp.bfloat16)
    if batch_size <= _SMALL_M_FAST_PATH:
        # Tiny-M fast path: a 1-step pallas grid is pure launch/DMA overhead.
        out = (
            jnp.dot(x_flat, w_fused_bf16, preferred_element_type=jnp.float32)
            + bias_row
        )
    else:
        out = fused_icosa_linear(x_flat, w_fused_bf16, bias_row)
    return out.reshape(batch_size, nbr_cam, out_channels)


# --------------------------------------------------------------------------
# Pure-JAX f32 reference replicating the original two-step torch forward.
# --------------------------------------------------------------------------
def reference_forward(x, mat_neighbors, weight, bias, out_channels):
    B, C, F = x.shape
    xp = jnp.transpose(x, (0, 2, 1)).reshape(B * F, C)
    y = xp @ mat_neighbors
    y = y.reshape(B, F, C, 7).transpose(0, 2, 1, 3).reshape(B * C, F * 7)
    y = y @ weight.T + bias
    return y.reshape(B, C, out_channels)


# --------------------------------------------------------------------------
# Main
# --------------------------------------------------------------------------
if __name__ == "__main__":
    mat_np, nbr_cam = build_mat_neighbors()  # (12, 84), 12 cameras

    nbr_features = 8
    out_channels = 16
    in_features = nbr_features * 7  # 56

    key = jax.random.PRNGKey(0)
    kx1, kx2, kw, kb = jax.random.split(key, 4)

    # deterministic "nn.Linear(in_features, out_channels)" parameters
    bound = 1.0 / np.sqrt(in_features)
    weight = jax.random.uniform(
        kw, (out_channels, in_features), minval=-bound, maxval=bound, dtype=jnp.float32
    )
    bias = jax.random.uniform(
        kb, (out_channels,), minval=-bound, maxval=bound, dtype=jnp.float32
    )
    mat_neighbors = jnp.asarray(mat_np, dtype=jnp.float32)

    # ---- init-time fusion (done once; analogous to building module buffers) ----
    w_fused_bf16, bias_row = prepare_fused_params(
        mat_neighbors, weight, bias, nbr_cam, nbr_features, out_channels
    )
    w_fused_bf16 = jax.block_until_ready(w_fused_bf16)
    bias_row = jax.block_until_ready(bias_row)

    # Case 1: tiny batch (module-typical shape) -> XLA fast path.
    x_small = jax.random.normal(kx1, (2, nbr_cam, nbr_features), dtype=jnp.float32)
    out_small = jax.block_until_ready(
        icosahedron_linear_forward(x_small, w_fused_bf16, bias_row, out_channels)
    )

    # Case 2: larger (ragged) batch -> Pallas kernel, cdiv-tiled grid with >=2
    # blocks and a masked partial last block.
    x_large = jax.random.normal(kx2, (300, nbr_cam, nbr_features), dtype=jnp.float32)
    out_large = jax.block_until_ready(
        icosahedron_linear_forward(x_large, w_fused_bf16, bias_row, out_channels)
    )

    # ---- correctness vs the f32 two-step reference (bf16 MXU inputs => ~1e-3
    #      relative drift; tolerance loosened accordingly) ----
    ref_small = reference_forward(x_small, mat_neighbors, weight, bias, out_channels)
    ref_large = reference_forward(x_large, mat_neighbors, weight, bias, out_channels)

    assert out_small.shape == (2, nbr_cam, out_channels)
    assert out_large.shape == (300, nbr_cam, out_channels)
    np.testing.assert_allclose(
        np.asarray(out_small), np.asarray(ref_small), rtol=2e-2, atol=2e-2
    )
    np.testing.assert_allclose(
        np.asarray(out_large), np.asarray(ref_large), rtol=2e-2, atol=2e-2
    )
    print("KERNEL_OK")
</pallas_src>

<mosaic_0001>
module attributes {stable_mosaic.version = 11 : i64} {
  func.func @_fused_linear_kernel(%arg0: i32, %arg1: memref<152x96xbf16, #tpu.memory_space<vmem>>, %arg2: memref<96x192xbf16, #tpu.memory_space<vmem>>, %arg3: memref<1x192xf32, #tpu.memory_space<vmem>>, %arg4: memref<152x192xf32, #tpu.memory_space<vmem>>) attributes {dimension_semantics = [#tpu.dimension_semantics<parallel>], iteration_bounds = array<i64: 2>, scalar_prefetch = 0 : i64, scratch_operands = 0 : i64, tpu.core_type = #tpu.core_type<tc>, window_params = [{transform_indices = @transform_0, window_bounds = array<i64: 152, 96>}, {pipeline_mode = #tpu.pipeline_mode<synchronous>, transform_indices = @transform_1, window_bounds = array<i64: 96, 192>}, {pipeline_mode = #tpu.pipeline_mode<synchronous>, transform_indices = @transform_2, window_bounds = array<i64: 1, 192>}, {transform_indices = @transform_3, window_bounds = array<i64: 152, 192>}]} {
    %c0 = arith.constant 0 : index
    %c0_0 = arith.constant 0 : index
    %0 = vector.load %arg1[%c0, %c0_0] : memref<152x96xbf16, #tpu.memory_space<vmem>>, vector<152x96xbf16>
    %c0_1 = arith.constant 0 : index
    %c0_2 = arith.constant 0 : index
    %1 = vector.load %arg2[%c0_1, %c0_2] : memref<96x192xbf16, #tpu.memory_space<vmem>>, vector<96x192xbf16>
    %cst = arith.constant dense<0.000000e+00> : vector<152x192xf32>
    %2 = tpu.matmul %0, %1, %cst {dimension_numbers = #tpu.dot_dimension_numbers<[1], [0], [0], [1], [0, 0, 1, 1], [], []>} : vector<152x96xbf16>, vector<96x192xbf16>, vector<152x192xf32> -> vector<152x192xf32>
    %c0_3 = arith.constant 0 : index
    %c0_4 = arith.constant 0 : index
    %3 = vector.load %arg3[%c0_3, %c0_4] : memref<1x192xf32, #tpu.memory_space<vmem>>, vector<1x192xf32>
    %4 = vector.broadcast %3 : vector<1x192xf32> to vector<152x192xf32>
    %5 = arith.addf %2, %4 : vector<152x192xf32>
    %c0_5 = arith.constant 0 : index
    %c0_6 = arith.constant 0 : index
    %6 = vector.load %arg4[%c0_5, %c0_6] : memref<152x192xf32, #tpu.memory_space<vmem>>, vector<152x192xf32>
    tpu.vector_store %arg4[%c0_5, %c0_6], %5 {strides = array<i32>} : memref<152x192xf32, #tpu.memory_space<vmem>>, vector<152x192xf32>,
    return
  }
  func.func @transform_0(%arg0: i32) -> (i32, i32) {
    %c0_i32 = arith.constant 0 : i32
    %c0_i32_0 = arith.constant 0 : i32
    return %arg0, %c0_i32 : i32, i32
  }
  func.func @transform_1(%arg0: i32) -> (i32, i32) {
    %c0_i32 = arith.constant 0 : i32
    %c0_i32_0 = arith.constant 0 : i32
    %c0_i32_1 = arith.constant 0 : i32
    return %c0_i32, %c0_i32_0 : i32, i32
  }
  func.func @transform_2(%arg0: i32) -> (i32, i32) {
    %c0_i32 = arith.constant 0 : i32
    %c0_i32_0 = arith.constant 0 : i32
    %c0_i32_1 = arith.constant 0 : i32
    return %c0_i32, %c0_i32_0 : i32, i32
  }
  func.func @transform_3(%arg0: i32) -> (i32, i32) {
    %c0_i32 = arith.constant 0 : i32
    %c0_i32_0 = arith.constant 0 : i32
    return %arg0, %c0_i32 : i32, i32
  }
}

</mosaic_0001>

<bundles_post_ra>
// kernel: tpu_custom_call.1
= control target key start
LH: loop header
LB: loop body
LE: loop exit
PB: predicated region body
PF: predicated region fallthrough
CT: control target
= control target key end

     0   :  { %s708_s12 = smov 0   ;;  %s901_s0 = inlined_call_operand.vmem [shape: bf16[300,96], index: 0, kind: input, shape index: {}]   ;;  %s902_s1 = inlined_call_operand.vmem [shape: bf16[96,192], index: 1, kind: input, shape index: {}]   ;;  %s903_s2 = inlined_call_operand.vmem [shape: f32[1,192], index: 2, kind: input, shape index: {}]   ;;  %s904_s3 = inlined_call_operand.vmem [shape: f32[300,192], index: 3, kind: output, shape index: {}]  }
   0x1 LB: > { %s587_s13 = sadd.s32 4294967295, %s685_s12   ;;  %p591_p0 = scmp.ge.s32.totalorder %s685_s12, 1  ;;  %s685_s12 = sphi %s708_s12, %s13_s12  }
   0x2   : > { %p138_p1 = scmp.lt.s32.totalorder %s685_s12, 3 }
   0x4   : > { %p139_p2 = pnand %p591_p0, %p138_p1 }
   0x5   : > { %s163_s16 = smul.u32 (!%p139_p2), 19, %s587_s13 }
   0x6   : > { %142 = sbr.rel (%p139_p2) target bundleno = 271 (0x10f), region = 32 }
   0x7   : > { %p164_p3 = scmp.lt.s32.totalorder (!%p139_p2), %s163_s16, 37 }
   0xb   : > { %v651_v0 = vld [vmem:[%s902_s1 + $0x54] ss:$8 sps:$4 sm:$0xff]   ;;  %v653_v1 = vld [vmem:[%s902_s1 + $0x50] ss:$8 sps:$4 sm:$0xff]   ;;  %v687_v2 = vmov 0   ;;  %s906_s16 = smov (!%p164_p3, %s163_s16), 37  ;;  %v210_v23 = vlaneseq }
   0xc   : > { %391 = vmatprep.mubr.bf16.mxu0 %v687_v2  ;;  %441 = vmatprep.mubr.bf16.mxu1 %v687_v2  ;;  %v654_v3 = vld [vmem:[%s902_s1 + $0x44] ss:$8 sps:$4 sm:$0xff]   ;;  %v656_v4 = vld [vmem:[%s902_s1 + $0x40] ss:$8 sps:$4 sm:$0xff]   ;;  %v657_v5 = vld [vmem:[%s902_s1 + $0x34] ss:$8 sps:$4 sm:$0xff]  }
   0xd   : > { %363 = vmatprep.subr.bf16.mxu0 %v651_v0  ;;  %630 = vmatprep.subr.bf16.mxu1 %v651_v0  ;;  %s592_s25 = sshll.u32 %s906_s16, 2  ;;  %v659_v6 = vld [vmem:[%s902_s1 + $0x30] ss:$8 sps:$4 sm:$0xff]   ;;  %v660_v7 = vld [vmem:[%s902_s1 + $0x24] ss:$8 sps:$4 sm:$0xff]   ;;  %vm328_vm0 = vcmask 785408  }
   0xe   : > { %364 = vmatpush1.bf16.msra.mxu0 %v653_v1  ;;  %636 = vmatpush1.bf16.msra.mxu1 %v653_v1  ;;  %s742_s30 = scalar_lea.vmem %s901_s0, %s592_s25  ;;  %v662_v8 = vld [vmem:[%s902_s1 + $0x20] ss:$8 sps:$4 sm:$0xff]   ;;  %v663_v9 = vld [vmem:[%s902_s1 + $0x14] ss:$8 sps:$4 sm:$0xff]   ;;  %v665_v10 = vld [vmem:[%s902_s1 + $0x10] ss:$8 sps:$4 sm:$0xff]  }
   0xf   : > { %365 = vmatprep.subr.bf16.mxu0 %v654_v3  ;;  %631 = vmatprep.subr.bf16.mxu1 %v654_v3  ;;  %v666_v11 = vld [vmem:[%s902_s1 + $0x4] ss:$8 sps:$4 sm:$0xff]   ;;  %v668_v12 = vld [vmem:[%s902_s1] ss:$8 sps:$4 sm:$0xff]   ;;  %v672_v16 = vld [vmem:[%s742_s30 + $0x30] sm:$0xff]   ;;  %v211_v24 = vshrl.u32 %v210_v23, 7 }
  0x10   : > { %v669_v13 = vld [vmem:[%s742_s30] sm:$0xff]   ;;  %v670_v14 = vld [vmem:[%s742_s30 + $0x28] sm:$0xff]   ;;  %v673_v17 = vld [vmem:[%s742_s30 + $0x10] sm:$0xff]   ;;  %s629_s20 = sshll.u32 %s906_s16, 4  ;;  %vm491_vm1 = vcmask 523264  }
  0x11   : > { %v671_v15 = vld [vmem:[%s742_s30 + $0x8] sm:$0xff]   ;;  %v674_v18 = vld [vmem:[%s742_s30 + $0x38] sm:$0xff]   ;;  %v676_v20 = vld [vmem:[%s742_s30 + $0x40] sm:$0xff]   ;;  %v212_v25 = vsub.s32 0, %v211_v24  ;;  %v216_v27 = vsub.s32 1, %v211_v24  ;;  %s801_s23 = scalar_lea.vmem %s904_s3, %s629_s20 }
  0x12   : > { %366 = vmatpush1.bf16.msra.mxu0 %v656_v4  ;;  %637 = vmatpush1.bf16.msra.mxu1 %v656_v4  ;;  %v675_v19 = vld [vmem:[%s742_s30 + $0x18] sm:$0xff]   ;;  %v677_v21 = vld [vmem:[%s742_s30 + $0x20] sm:$0xff]   ;;  %v678_v22 = vld [vmem:[%s742_s30 + $0x48] ss:$0 sps:$4 sm:$0xff]  }
  0x13   : > { %367 = vmatprep.subr.bf16.mxu0 %v657_v5  ;;  %632 = vmatprep.subr.bf16.mxu1 %v657_v5  ;;  %v208_v26 = vld [vmem:[%s903_s2] sm:$0x3] }
  0x14   : > { %v794_v28 = vrot.slane %v208_v26, %v212_v25  ;;  %v796_v29 = vrot.slane %v208_v26, %v216_v27 }
  0x16   : > { %368 = vmatpush1.bf16.msra.mxu0 %v659_v6  ;;  %638 = vmatpush1.bf16.msra.mxu1 %v659_v6 }
  0x17   : > { %369 = vmatprep.subr.bf16.mxu0 %v660_v7  ;;  %633 = vmatprep.subr.bf16.mxu1 %v660_v7 }
  0x1a   : > { %370 = vmatpush1.bf16.msra.mxu0 %v662_v8  ;;  %639 = vmatpush1.bf16.msra.mxu1 %v662_v8 }
  0x1b   : > { %371 = vmatprep.subr.bf16.mxu0 %v663_v9  ;;  %634 = vmatprep.subr.bf16.mxu1 %v663_v9 }
  0x1e   : > { %372 = vmatpush1.bf16.msra.mxu0 %v665_v10  ;;  %640 = vmatpush1.bf16.msra.mxu1 %v665_v10 }
  0x1f   : > { %373 = vmatprep.subr.bf16.mxu0 %v666_v11  ;;  %635 = vmatprep.subr.bf16.mxu1 %v666_v11 }
  0x22   : > { %374 = vmatpush1.bf16.msra.mxu0 %v668_v12  ;;  %641 = vmatpush1.bf16.msra.mxu1 %v668_v12 }
  0x25   : > { %617 = vmatmul.mubr.msk.bf16.vlgmr.msra.gmra.mxu0 %vm328_vm0, %v669_v13  ;;  %622 = vmatmul.mubr.msk.bf16.vlgmr.msra.gmra.mxu1 %vm328_vm0, %v670_v14 }
  0x26   : > { %401 = vmatprep.mubr.bf16.mxu0 %v687_v2  ;;  %451 = vmatprep.mubr.bf16.mxu1 %v687_v2 }
  0x2d   : > { %618 = vmatmul.mubr.msk.bf16.gmra.mxu0 %vm328_vm0, %v671_v15  ;;  %623 = vmatmul.mubr.msk.bf16.gmra.mxu1 %vm328_vm0, %v672_v16 }
  0x2e   : > { %411 = vmatprep.mubr.bf16.mxu0 %v687_v2  ;;  %461 = vmatprep.mubr.bf16.mxu1 %v687_v2 }
  0x35   : > { %619 = vmatmul.mubr.msk.bf16.gmra.mxu0 %vm328_vm0, %v673_v17  ;;  %624 = vmatmul.mubr.msk.bf16.gmra.mxu1 %vm328_vm0, %v674_v18 }
  0x36   : > { %421 = vmatprep.mubr.bf16.mxu0 %v687_v2  ;;  %471 = vmatprep.mubr.bf16.mxu1 %v687_v2 }
  0x3d   : > { %620 = vmatmul.mubr.msk.bf16.gmra.mxu0 %vm328_vm0, %v675_v19  ;;  %625 = vmatmul.mubr.msk.bf16.gmra.mxu1 %vm328_vm0, %v676_v20 }
  0x3e   : > { %431 = vmatprep.mubr.bf16.mxu0 %v687_v2  ;;  %481 = vmatprep.mubr.bf16.mxu1 %v687_v2 }
  0x45   : > { %621 = vmatmul.mubr.msk.bf16.gmra.mxu0 %vm328_vm0, %v677_v21  ;;  %626 = vmatmul.mubr.msk.bf16.gmra.mxu1 %vm328_vm0, %v678_v22 }
  0xe5   : > { %v393_v30 = vpop.f32.mrf.mxu0  ;;  %v443_v31 = vpop.f32.mrf.mxu1 }
  0xe6   : > { %v394_v32 = vadd.f32 %v393_v30, %v794_v28  ;;  %v444_v33 = vadd.f32 %v443_v31, %v794_v28 }
  0xe7   : > { %v395_v34 = vpop.f32.mrf.mxu0  ;;  %v445_v35 = vpop.f32.mrf.mxu1 }
  0xe8   : > { %490 = vst [vmem:[%s801_s23] sm:$0xff] %v394_v32  ;;  %511 = vst [vmem:[%s801_s23 + $0xa0] sm:$0xff] %v444_v33  ;;  %v396_v36 = vadd.f32 %v395_v34, %v796_v29  ;;  %v446_v37 = vadd.f32 %v445_v35, %v796_v29 }
  0xe9   : > { %v397_v38 = vpop.f32.mrf.mxu0  ;;  %v447_v39 = vpop.f32.mrf.mxu1 }
  0xea   : > { %492 = vst.msk [vmem:[%s801_s23 + $0x8] sm:$0xff] %vm491_vm1, %v396_v36  ;;  %512 = vst.msk [vmem:[%s801_s23 + $0xa8] sm:$0xff] %vm491_vm1, %v446_v37  ;;  %v398_v40 = vadd.f32 %v397_v38, %v794_v28  ;;  %v448_v41 = vadd.f32 %v447_v39, %v794_v28 }
  0xeb   : > { %v399_v42 = vpop.f32.mrf.mxu0  ;;  %v449_v43 = vpop.f32.mrf.mxu1 }
  0xec   : > { %493 = vst [vmem:[%s801_s23 + $0x10] sm:$0xff] %v398_v40  ;;  %513 = vst [vmem:[%s801_s23 + $0xb0] sm:$0xff] %v448_v41  ;;  %v400_v44 = vadd.f32 %v399_v42, %v796_v29  ;;  %v450_v45 = vadd.f32 %v449_v43, %v796_v29 }
  0xed   : > { %v403_v46 = vpop.f32.mrf.mxu0  ;;  %v453_v47 = vpop.f32.mrf.mxu1 }
  0xee   : > { %494 = vst.msk [vmem:[%s801_s23 + $0x18] sm:$0xff] %vm491_vm1, %v400_v44  ;;  %514 = vst.msk [vmem:[%s801_s23 + $0xb8] sm:$0xff] %vm491_vm1, %v450_v45  ;;  %v404_v48 = vadd.f32 %v403_v46, %v794_v28  ;;  %v454_v49 = vadd.f32 %v453_v47, %v794_v28 }
  0xef   : > { %v405_v50 = vpop.f32.mrf.mxu0  ;;  %v455_v51 = vpop.f32.mrf.mxu1 }
  0xf0   : > { %495 = vst [vmem:[%s801_s23 + $0x20] sm:$0xff] %v404_v48  ;;  %515 = vst [vmem:[%s801_s23 + $0xc0] sm:$0xff] %v454_v49  ;;  %v406_v52 = vadd.f32 %v405_v50, %v796_v29  ;;  %v456_v53 = vadd.f32 %v455_v51, %v796_v29 }
  0xf1   : > { %v407_v54 = vpop.f32.mrf.mxu0  ;;  %v457_v55 = vpop.f32.mrf.mxu1 }
  0xf2   : > { %496 = vst.msk [vmem:[%s801_s23 + $0x28] sm:$0xff] %vm491_vm1, %v406_v52  ;;  %516 = vst.msk [vmem:[%s801_s23 + $0xc8] sm:$0xff] %vm491_vm1, %v456_v53  ;;  %v408_v56 = vadd.f32 %v407_v54, %v794_v28  ;;  %v458_v57 = vadd.f32 %v457_v55, %v794_v28 }
  0xf3   : > { %v409_v58 = vpop.f32.mrf.mxu0  ;;  %v459_v59 = vpop.f32.mrf.mxu1 }
  0xf4   : > { %497 = vst [vmem:[%s801_s23 + $0x30] sm:$0xff] %v408_v56  ;;  %517 = vst [vmem:[%s801_s23 + $0xd0] sm:$0xff] %v458_v57  ;;  %v410_v60 = vadd.f32 %v409_v58, %v796_v29  ;;  %v460_v61 = vadd.f32 %v459_v59, %v796_v29 }
  0xf5   : > { %v413_v62 = vpop.f32.mrf.mxu0  ;;  %v463_v63 = vpop.f32.mrf.mxu1 }
  0xf6   : > { %498 = vst.msk [vmem:[%s801_s23 + $0x38] sm:$0xff] %vm491_vm1, %v410_v60  ;;  %518 = vst.msk [vmem:[%s801_s23 + $0xd8] sm:$0xff] %vm491_vm1, %v460_v61  ;;  %v414_v0 = vadd.f32 %v413_v62, %v794_v28  ;;  %v464_v1 = vadd.f32 %v463_v63, %v794_v28 }
  0xf7   : > { %v415_v2 = vpop.f32.mrf.mxu0  ;;  %v465_v3 = vpop.f32.mrf.mxu1 }
  0xf8   : > { %499 = vst [vmem:[%s801_s23 + $0x40] sm:$0xff] %v414_v0  ;;  %519 = vst [vmem:[%s801_s23 + $0xe0] sm:$0xff] %v464_v1  ;;  %v416_v4 = vadd.f32 %v415_v2, %v796_v29  ;;  %v466_v5 = vadd.f32 %v465_v3, %v796_v29 }
  0xf9   : > { %v417_v6 = vpop.f32.mrf.mxu0  ;;  %v467_v7 = vpop.f32.mrf.mxu1 }
  0xfa   : > { %500 = vst.msk [vmem:[%s801_s23 + $0x48] sm:$0xff] %vm491_vm1, %v416_v4  ;;  %520 = vst.msk [vmem:[%s801_s23 + $0xe8] sm:$0xff] %vm491_vm1, %v466_v5  ;;  %v418_v8 = vadd.f32 %v417_v6, %v794_v28  ;;  %v468_v9 = vadd.f32 %v467_v7, %v794_v28 }
  0xfb   : > { %v419_v10 = vpop.f32.mrf.mxu0  ;;  %v469_v11 = vpop.f32.mrf.mxu1 }
  0xfc   : > { %501 = vst [vmem:[%s801_s23 + $0x50] sm:$0xff] %v418_v8  ;;  %521 = vst [vmem:[%s801_s23 + $0xf0] sm:$0xff] %v468_v9  ;;  %v420_v12 = vadd.f32 %v419_v10, %v796_v29  ;;  %v470_v13 = vadd.f32 %v469_v11, %v796_v29 }
  0xfd   : > { %v423_v14 = vpop.f32.mrf.mxu0  ;;  %v473_v15 = vpop.f32.mrf.mxu1 }
  0xfe   : > { %502 = vst.msk [vmem:[%s801_s23 + $0x58] sm:$0xff] %vm491_vm1, %v420_v12  ;;  %522 = vst.msk [vmem:[%s801_s23 + $0xf8] sm:$0xff] %vm491_vm1, %v470_v13  ;;  %v424_v16 = vadd.f32 %v423_v14, %v794_v28  ;;  %v474_v17 = vadd.f32 %v473_v15, %v794_v28 }
  0xff   : > { %v425_v18 = vpop.f32.mrf.mxu0  ;;  %v475_v19 = vpop.f32.mrf.mxu1 }
 0x100   : > { %503 = vst [vmem:[%s801_s23 + $0x60] sm:$0xff] %v424_v16  ;;  %523 = vst [vmem:[%s801_s23 + $0x100] sm:$0xff] %v474_v17  ;;  %v426_v20 = vadd.f32 %v425_v18, %v796_v29  ;;  %v476_v21 = vadd.f32 %v475_v19, %v796_v29 }
 0x101   : > { %v427_v22 = vpop.f32.mrf.mxu0  ;;  %v477_v23 = vpop.f32.mrf.mxu1 }
 0x102   : > { %504 = vst.msk [vmem:[%s801_s23 + $0x68] sm:$0xff] %vm491_vm1, %v426_v20  ;;  %524 = vst.msk [vmem:[%s801_s23 + $0x108] sm:$0xff] %vm491_vm1, %v476_v21  ;;  %v428_v24 = vadd.f32 %v427_v22, %v794_v28  ;;  %v478_v25 = vadd.f32 %v477_v23, %v794_v28 }
 0x103   : > { %v429_v26 = vpop.f32.mrf.mxu0  ;;  %v479_v27 = vpop.f32.mrf.mxu1 }
 0x104   : > { %505 = vst [vmem:[%s801_s23 + $0x70] sm:$0xff] %v428_v24  ;;  %525 = vst [vmem:[%s801_s23 + $0x110] sm:$0xff] %v478_v25  ;;  %v430_v30 = vadd.f32 %v429_v26, %v796_v29  ;;  %v480_v31 = vadd.f32 %v479_v27, %v796_v29 }
 0x105   : > { %v433_v32 = vpop.f32.mrf.mxu0  ;;  %v483_v33 = vpop.f32.mrf.mxu1 }
 0x106   : > { %506 = vst.msk [vmem:[%s801_s23 + $0x78] sm:$0xff] %vm491_vm1, %v430_v30  ;;  %526 = vst.msk [vmem:[%s801_s23 + $0x118] sm:$0xff] %vm491_vm1, %v480_v31  ;;  %v434_v34 = vadd.f32 %v433_v32, %v794_v28  ;;  %v484_v35 = vadd.f32 %v483_v33, %v794_v28 }
 0x107   : > { %v435_v36 = vpop.f32.mrf.mxu0  ;;  %v485_v37 = vpop.f32.mrf.mxu1 }
 0x108   : > { %507 = vst [vmem:[%s801_s23 + $0x80] sm:$0xff] %v434_v34  ;;  %527 = vst [vmem:[%s801_s23 + $0x120] sm:$0xff] %v484_v35  ;;  %v436_v38 = vadd.f32 %v435_v36, %v796_v29  ;;  %v486_v39 = vadd.f32 %v485_v37, %v796_v29 }
 0x109   : > { %v437_v40 = vpop.f32.mrf.mxu0  ;;  %v487_v41 = vpop.f32.mrf.mxu1 }
 0x10a   : > { %508 = vst.msk [vmem:[%s801_s23 + $0x88] sm:$0xff] %vm491_vm1, %v436_v38  ;;  %528 = vst.msk [vmem:[%s801_s23 + $0x128] sm:$0xff] %vm491_vm1, %v486_v39  ;;  %v438_v42 = vadd.f32 %v437_v40, %v794_v28 }
 0x10b   : > { %v439_v43 = vpop.f32.mrf.mxu0  ;;  %v488_v44 = vpop.f32.mrf.mxu1 }
 0x10c   : > { %509 = vst [vmem:[%s801_s23 + $0x90] sm:$0xff] %v438_v42  ;;  %v440_v45 = vadd.f32 %v439_v43, %v796_v29 }
 0x10e   : > { %510 = vst.msk [vmem:[%s801_s23 + $0x98] sm:$0xff] %vm491_vm1, %v440_v45 }
 0x10f PF: > { %s13_s12 = sadd.s32 1, %s685_s12  }
 0x110   : > { %p10_p4 = scmp.ge.s32.totalorder %s13_s12, 4  }
 0x112   :  { %12 = sbr.rel (!%p10_p4) target bundleno = 1 (0x1), region = 62 }

</bundles_post_ra>
